<compile_context>
chip_gen: v5e
topology: v5e:2x2
jax: 0.10.0
libtpu: 0.0.40
codegen_flags: <defaults>
</compile_context>

<pallas_src>
import functools

import jax
import jax.numpy as jnp
from jax.experimental import pallas as pl
from jax.experimental.pallas import tpu as pltpu


def _round_up(x: int, m: int) -> int:
    return ((x + m - 1) // m) * m


# ---------------------------------------------------------------------------
# Kernel: fused trunk + fused (actor|critic) head, single lane-dense output.
# Packed-parameter row layout (lane width = hp, a multiple of 128):
#   rows [0,            dp)           : W1      (dp, hp)   zero-padded
#   rows [dp,           dp+8)         : b1 in row dp
#   rows [dp+8,         dp+8+hp)      : W_heads (hp, hp)   cols [0,A)=actor, col A=critic
#   rows [dp+8+hp,      dp+16+hp)     : b_heads in row dp+8+hp
# ---------------------------------------------------------------------------
def _nnbase_fused_kernel(x_ref, p_ref, out_ref, *, dp, hp):
    x = x_ref[...]                                         # (Bp, dp) f32

    w1 = p_ref[pl.ds(0, dp), :]                            # (dp, hp)
    b1 = p_ref[pl.ds(dp, 1), :]                            # (1, hp)
    wh = p_ref[pl.ds(dp + 8, hp), :]                       # (hp, hp)
    bh = p_ref[pl.ds(dp + 8 + hp, 1), :]                   # (1, hp)

    # Shared trunk: one MXU pass, bias + ReLU on the VPU in f32.
    h = jnp.dot(x, w1, preferred_element_type=jnp.float32) + b1
    h = jnp.maximum(h, 0.0)                                # (Bp, hp)

    # Fused heads: single MXU pass producing a lane-dense (Bp, hp) slab.
    out = jnp.dot(h, wh, preferred_element_type=jnp.float32) + bh
    out_ref[...] = out.astype(out_ref.dtype)               # unmasked 128-lane stores


# ---------------------------------------------------------------------------
# Host-side parameter packing (done once, outside the hot path).
# ---------------------------------------------------------------------------
def pack_params(params, d_in: int, hidden: int, n_actions: int):
    """Pack (w1,b1,wa,ba,wc,bc) into one lane-dense (R, Hp) f32 buffer."""
    w1, b1, wa, ba, wc, bc = params
    dp = _round_up(d_in, 8)
    hp = _round_up(hidden, 128)
    rows = dp + 8 + hp + 8

    buf = jnp.zeros((rows, hp), jnp.float32)
    buf = buf.at[:d_in, :hidden].set(w1)
    buf = buf.at[dp, :hidden].set(b1.reshape(-1))

    w_heads = jnp.concatenate([wa, wc], axis=1)            # (hidden, A+1)
    b_heads = jnp.concatenate([ba, bc], axis=1)            # (1, A+1)
    buf = buf.at[dp + 8:dp + 8 + hidden, :n_actions + 1].set(w_heads)
    buf = buf.at[dp + 8 + hp, :n_actions + 1].set(b_heads.reshape(-1))
    return buf


# ---------------------------------------------------------------------------
# Forward wrapper.
# ---------------------------------------------------------------------------
def nnbase_forward(state, packed, *, d_in: int, hidden: int, n_actions: int):
    """state: (B, d_in) f32.  Returns (actor (B, A), critic (B, 1))."""
    B, D = state.shape
    assert D == d_in
    dp = _round_up(D, 8)
    hp = _round_up(hidden, 128)
    bp = _round_up(B, 8)

    x = state
    if (bp, dp) != (B, D):
        x = jnp.zeros((bp, dp), state.dtype).at[:B, :D].set(state)

    kernel = functools.partial(_nnbase_fused_kernel, dp=dp, hp=hp)

    out = pl.pallas_call(
        kernel,
        out_shape=jax.ShapeDtypeStruct((bp, hp), jnp.float32),
        # Whole arrays resident in VMEM: 2 input DMAs + 1 lane-dense output DMA.
        in_specs=[
            pl.BlockSpec(memory_space=pltpu.MemorySpace.VMEM),   # state
            pl.BlockSpec(memory_space=pltpu.MemorySpace.VMEM),   # packed params
        ],
        out_specs=pl.BlockSpec(memory_space=pltpu.MemorySpace.VMEM),
    )(x, packed)

    actor = out[:B, :n_actions]
    critic = out[:B, n_actions:n_actions + 1]
    return actor, critic


# ---------------------------------------------------------------------------
# Deterministic parameter init (PyTorch nn.Linear fan-in uniform).
# ---------------------------------------------------------------------------
def init_params(key, d_in, hidden, n_actions):
    k1, k2, k3 = jax.random.split(key, 3)

    def linear(k, fan_in, fan_out):
        bound = 1.0 / jnp.sqrt(fan_in)
        kw, kb = jax.random.split(k)
        w = jax.random.uniform(kw, (fan_in, fan_out), jnp.float32, -bound, bound)
        b = jax.random.uniform(kb, (1, fan_out), jnp.float32, -bound, bound)
        return w, b

    w1, b1 = linear(k1, d_in, hidden)
    wa, ba = linear(k2, hidden, n_actions)
    wc, bc = linear(k3, hidden, 1)
    return (w1, b1, wa, ba, wc, bc)


def nnbase_forward_ref(state, params):
    """Pure-JAX reference for correctness check."""
    w1, b1, wa, ba, wc, bc = params
    h = jnp.maximum(state @ w1 + b1, 0.0)
    return h @ wa + ba, h @ wc + bc


if __name__ == "__main__":
    B, D, H, A = 8, 32, 128, 8   # small shapes consistent with an RL state net
    key = jax.random.PRNGKey(0)
    k_x, k_p = jax.random.split(key)

    state = jax.random.normal(k_x, (B, D), jnp.float32)
    params = init_params(k_p, D, H, A)
    packed = pack_params(params, D, H, A)       # one-time host-side packing

    actor, critic = nnbase_forward(state, packed, d_in=D, hidden=H, n_actions=A)
    jax.block_until_ready((actor, critic))

    actor_ref, critic_ref = nnbase_forward_ref(state, params)
    assert actor.shape == (B, A) and critic.shape == (B, 1)
    assert jnp.allclose(actor, actor_ref, atol=1e-5, rtol=1e-5)
    assert jnp.allclose(critic, critic_ref, atol=1e-5, rtol=1e-5)

    print("KERNEL_OK")
</pallas_src>

<mosaic_0001>
module attributes {stable_mosaic.version = 11 : i64} {
  func.func @_nnbase_fused_kernel(%arg0: memref<8x32xf32, #tpu.memory_space<vmem>>, %arg1: memref<176x128xf32, #tpu.memory_space<vmem>>, %arg2: memref<8x128xf32, #tpu.memory_space<vmem>>) attributes {dimension_semantics = [], scalar_prefetch = 0 : i64, scratch_operands = 0 : i64, tpu.core_type = #tpu.core_type<tc>} {
    %c0 = arith.constant 0 : index
    %c0_0 = arith.constant 0 : index
    %0 = vector.load %arg0[%c0, %c0_0] : memref<8x32xf32, #tpu.memory_space<vmem>>, vector<8x32xf32>
    %c0_1 = arith.constant 0 : index
    %c0_2 = arith.constant 0 : index
    %1 = vector.load %arg1[%c0_1, %c0_2] : memref<176x128xf32, #tpu.memory_space<vmem>>, vector<32x128xf32>
    %c32 = arith.constant 32 : index
    %c0_3 = arith.constant 0 : index
    %2 = vector.load %arg1[%c32, %c0_3] : memref<176x128xf32, #tpu.memory_space<vmem>>, vector<1x128xf32>
    %c40 = arith.constant 40 : index
    %c0_4 = arith.constant 0 : index
    %3 = vector.load %arg1[%c40, %c0_4] : memref<176x128xf32, #tpu.memory_space<vmem>>, vector<128x128xf32>
    %c168 = arith.constant 168 : index
    %c0_5 = arith.constant 0 : index
    %4 = vector.load %arg1[%c168, %c0_5] : memref<176x128xf32, #tpu.memory_space<vmem>>, vector<1x128xf32>
    %cst = arith.constant dense<0.000000e+00> : vector<8x128xf32>
    %5 = tpu.matmul %0, %1, %cst {dimension_numbers = #tpu.dot_dimension_numbers<[1], [0], [0], [1], [0, 0, 1, 1], [], []>} : vector<8x32xf32>, vector<32x128xf32>, vector<8x128xf32> -> vector<8x128xf32>
    %6 = vector.broadcast %2 : vector<1x128xf32> to vector<8x128xf32>
    %7 = arith.addf %5, %6 : vector<8x128xf32>
    %cst_6 = arith.constant 0.000000e+00 : f32
    %8 = vector.broadcast %cst_6 : f32 to vector<8x128xf32>
    %9 = arith.maximumf %7, %8 : vector<8x128xf32>
    %cst_7 = arith.constant dense<0.000000e+00> : vector<8x128xf32>
    %10 = tpu.matmul %9, %3, %cst_7 {dimension_numbers = #tpu.dot_dimension_numbers<[1], [0], [0], [1], [0, 0, 1, 1], [], []>} : vector<8x128xf32>, vector<128x128xf32>, vector<8x128xf32> -> vector<8x128xf32>
    %11 = vector.broadcast %4 : vector<1x128xf32> to vector<8x128xf32>
    %12 = arith.addf %10, %11 : vector<8x128xf32>
    %c0_8 = arith.constant 0 : index
    %c0_9 = arith.constant 0 : index
    %13 = vector.load %arg2[%c0_8, %c0_9] : memref<8x128xf32, #tpu.memory_space<vmem>>, vector<8x128xf32>
    tpu.vector_store %arg2[%c0_8, %c0_9], %12 {strides = array<i32>} : memref<8x128xf32, #tpu.memory_space<vmem>>, vector<8x128xf32>,
    return
  }
}

</mosaic_0001>

<bundles_post_ra>
// kernel: tpu_custom_call.1
= control target key start
LH: loop header
LB: loop body
LE: loop exit
PB: predicated region body
PF: predicated region fallthrough
CT: control target
= control target key end

     0   :  { %7 = vsyncpa [#allocation3], 0  ;;  %s246_s0 = inlined_call_operand.hbm [shape: f32[8,32], index: 0, kind: input, shape index: {}]   ;;  %s247_s1 = inlined_call_operand.hbm [shape: f32[176,128], index: 1, kind: input, shape index: {}]   ;;  %s248_s2 = inlined_call_operand.hbm [shape: f32[8,128], index: 2, kind: output, shape index: {}]  }
   0x1   :  { %8 = vsyncpa [#allocation6], 0 }
   0x2   :  { %9 = vsyncpa [#allocation4], 0  ;;  %s15_s11 = sshll.u32 %s246_s0, 4  ;;  %s217_s12 = smov [#allocation2]   ;;  %s16_s11 = int_to_ptr.hbm [resolvable:$true] %s15_s11 }
   0x3   :  { %s17_s13 = sshll.u32 %s217_s12, 4  ;;  %s25_s16 = sshll.u32 %s247_s1, 4  ;;  %s18_s13 = int_to_ptr.vmem [resolvable:$true] %s17_s13  ;;  %s26_s16 = int_to_ptr.hbm [resolvable:$true] %s25_s16 }
   0x4   :  { %20 = dma.hbm_to_vmem [thread:$0]  %s16_s11, 128, %s18_s13, [#allocation3]  }
   0x5   :  { %s218_s17 = smov [#allocation5]   ;;  %s219_s19 = smov 128  }
   0x6   :  { %s27_s18 = sshll.u32 %s218_s17, 4  ;;  %s220_s20 = smov 8   ;;  %s28_s18 = int_to_ptr.vmem [resolvable:$true] %s27_s18 }
   0x7   :  { %33 = dma.hbm_to_vmem [thread:$0]  %s26_s16, 2816, %s28_s18, [#allocation6], %s219_s19, %s219_s19, %s220_s20  }
   0x8   :  { %211 = dma.done.wait [#allocation3], 128  }
   0x9   :  { %212 = vsyncadd [#allocation3], 4294967168 }
   0xa   :  { %213 = dma.done.wait [#allocation6], 2816  }
   0xb   :  { %214 = vsyncadd [#allocation6], 4294964480  ;;  %v46_v0 = vld [vmem:[#allocation5 + $0x18] sm:$0xff]  ;;  %v45_v1 = vld [vmem:[#allocation5 + $0x10] sm:$0xff]  ;;  %vm66_vm0 = vcmask 261120   ;;  %s221_s0 = smov [#allocation7]  }
   0xc   :  { %82 = vmatpush.msra.mxu0 %v46_v0  ;;  %v63_v2 = vld [vmem:[#allocation5 + $0xa0] sm:$0xff]  ;;  %v44_v3 = vld [vmem:[#allocation5 + $0x8] sm:$0xff]  ;;  %v62_v4 = vld [vmem:[#allocation5 + $0x98] sm:$0xff]  ;;  %s118_s1 = sshll.u32 %s221_s0, 4  ;;  %s120_s23 = sshll.u32 %s248_s2, 4  ;;  %s119_s1 = int_to_ptr.vmem [resolvable:$true] %s118_s1  ;;  %s121_s23 = int_to_ptr.hbm [resolvable:$true] %s120_s23 }
   0xd   :  { %92 = vmatpush.msra.mxu1 %v63_v2  ;;  %v61_v5 = vld [vmem:[#allocation5 + $0x90] sm:$0xff]  ;;  %v43_v6 = vld [vmem:[#allocation5] sm:$0xff]  ;;  %v42_v7 = vld [vmem:[#allocation2] sm:$0xff] }
   0xe   :  { %83 = vmatpush.msra.mxu0 %v45_v1  ;;  %v60_v8 = vld [vmem:[#allocation5 + $0x88] sm:$0xff]  ;;  %v59_v9 = vld [vmem:[#allocation5 + $0x80] sm:$0xff]  ;;  %v58_v10 = vld [vmem:[#allocation5 + $0x78] sm:$0xff] }
   0xf   :  { %93 = vmatpush.msra.mxu1 %v62_v4  ;;  %v57_v11 = vld [vmem:[#allocation5 + $0x70] sm:$0xff]  ;;  %v56_v12 = vld [vmem:[#allocation5 + $0x68] sm:$0xff]  ;;  %v55_v13 = vld [vmem:[#allocation5 + $0x60] sm:$0xff] }
  0x10   :  { %84 = vmatpush.msra.mxu0 %v44_v3  ;;  %v54_v14 = vld [vmem:[#allocation5 + $0x58] sm:$0xff]  ;;  %v53_v15 = vld [vmem:[#allocation5 + $0x50] sm:$0xff]  ;;  %v52_v16 = vld [vmem:[#allocation5 + $0x48] sm:$0xff] }
  0x11   :  { %94 = vmatpush.msra.mxu1 %v61_v5  ;;  %v51_v17 = vld [vmem:[#allocation5 + $0x40] sm:$0xff]  ;;  %v50_v18 = vld [vmem:[#allocation5 + $0x38] sm:$0xff]  ;;  %v49_v19 = vld [vmem:[#allocation5 + $0x30] sm:$0xff] }
  0x12   :  { %85 = vmatpush.msra.mxu0 %v43_v6  ;;  %v48_v20 = vld [vmem:[#allocation5 + $0x28] sm:$0xff]  ;;  %v137_v21 = vld [vmem:[#allocation5 + $0x20] ss:$0 sm:$0xff] }
  0x13   :  { %131 = vmatmul.msk.f32.vlgmr.msra.gmra.mxu0 %vm66_vm0, %v42_v7  ;;  %95 = vmatpush.msra.mxu1 %v60_v8  ;;  %v138_v25 = vld [vmem:[#allocation5 + $0xa8] ss:$0 sm:$0xff] }
  0x15   :  { %96 = vmatpush.msra.mxu1 %v59_v9 }
  0x17   :  { %97 = vmatpush.msra.mxu1 %v58_v10 }
  0x19   :  { %98 = vmatpush.msra.mxu1 %v57_v11 }
  0x1b   :  { %99 = vmatpush.msra.mxu1 %v56_v12 }
  0x1d   :  { %100 = vmatpush.msra.mxu1 %v55_v13 }
  0x1f   :  { %101 = vmatpush.msra.mxu1 %v54_v14 }
  0x21   :  { %102 = vmatpush.msra.mxu1 %v53_v15 }
  0x23   :  { %103 = vmatpush.msra.mxu1 %v52_v16 }
  0x25   :  { %104 = vmatpush.msra.mxu1 %v51_v17 }
  0x27   :  { %105 = vmatpush.msra.mxu1 %v50_v18 }
  0x29   :  { %106 = vmatpush.msra.mxu1 %v49_v19 }
  0x2b   :  { %107 = vmatpush.msra.mxu1 %v48_v20 }
  0x90   :  { %v87_v22 = vpop.f32.mrf.mxu0 }
  0x91   :  { %v88_v23 = vadd.f32 %v137_v21, %v87_v22 }
  0x93   :  { %v90_v24 = vmax.f32 %v88_v23, 0.0 }
  0x95   :  { %108 = vmatmul.f32.vlgmr.msra.gmra.mxu1 %v90_v24 }
 0x112   :  { %v109_v26 = vpop.f32.mrf.mxu1 }
 0x113   :  { %v110_v27 = vadd.f32 %v138_v25, %v109_v26 }
 0x115   :  { %112 = vst [vmem:[#allocation7] sm:$0xff] %v110_v27 }
 0x116   :  { %123 = dma.vmem_to_hbm [thread:$0]  %s119_s1, 128, %s121_s23, [#allocation4]  }
 0x117   :  { %215 = dma.done.wait [#allocation4], 128  }
 0x118   :  { %216 = vsyncadd [#allocation4], 4294967168 }
 0x119   :  { %128 = vsyncpa [#allocation3], 1 }
 0x11a   :  { %129 = vsyncpa [#allocation6], 1 }
 0x11b   :  { %130 = vsyncpa [#allocation4], 1 }

</bundles_post_ra>
